<compile_context>
chip_gen: v7x
topology: tpu7x:2x2x1
jax: 0.10.0
libtpu: 0.0.40
codegen_flags: <defaults>
</compile_context>

<pallas_src>
import jax
import jax.numpy as jnp
from jax.experimental import pallas as pl
from jax.experimental.pallas import tpu as pltpu


_PARAM_LANES = 128      # packed parameter buffer is (rows, 128): one aligned DMA
_LANE_ALIGN = 128       # lane-tile granularity (vreg lane width)
_MAX_LANE_TILE = 2048   # (n_input, 2048) f32 tile = 32 KiB; amortizes ~0.35 us/step grid cost


def _round_up(n, m):
    return ((n + m - 1) // m) * m


def _choose_tile(batch, max_tile):
    """Lane-tile size. Keeps blocks <= batch for batch >= 128 and rounds the grid
    step count to a multiple of 2 so v7x's two TensorCores split the work evenly."""
    if batch < _LANE_ALIGN:
        return batch                                   # single exact block
    tile = min(max_tile, (batch // _LANE_ALIGN) * _LANE_ALIGN)
    steps = -(-batch // tile)
    if steps > 1 and steps % 2:
        steps += 1                                     # even step count for v7x's 2 TCs
        tile = max(_LANE_ALIGN, _round_up(-(-batch // steps), _LANE_ALIGN))
    return tile


def _make_kernel(n_input, n_hidden, n_output):
    c_b1 = n_input                   # packed column holding b1
    c_w2 = n_input + 1               # first packed column holding a row of w2 (as a column)
    c_b2 = n_input + 1 + n_output    # packed column holding b2 (rows 0:n_output)

    def kernel(x_ref, p_ref, o_ref):
        # x_ref: (n_input, tile_b)   batch on lanes (dense)
        # p_ref: (rows, 128)         packed [w1 | b1 | w2^T | b2], VMEM-resident
        # o_ref: (n_output, tile_b)  lane-dense output
        x = x_ref[...]
        p = p_ref[...]

        # fc1 + bias as n_input VPU multiply-adds (outer-product accumulation).
        # A K=4 matmul would use <2% of the MXU and add push/result-FIFO latency.
        h = p[:n_hidden, c_b1:c_b1 + 1]                      # (n_hidden, 1) bias
        for k in range(n_input):                             # static unroll (n_input tiny)
            h = h + p[:n_hidden, k:k + 1] * x[k:k + 1, :]    # -> (n_hidden, tile_b)
        h = jnp.maximum(h, 0.0)                              # ReLU (VPU)

        # fc2: per-output broadcast-multiply (VPU) + hidden/sublane reduction (XLU).
        rows = []
        for o in range(n_output):                            # static unroll (n_output tiny)
            w2_col = p[:n_hidden, c_w2 + o:c_w2 + o + 1]     # (n_hidden, 1) == w2[o, :]
            b2_o = p[o:o + 1, c_b2:c_b2 + 1]                 # (1, 1)
            rows.append(jnp.sum(h * w2_col, axis=0, keepdims=True) + b2_o)
        y = rows[0] if n_output == 1 else jnp.concatenate(rows, axis=0)
        o_ref[...] = y.astype(o_ref.dtype)

    return kernel


def prepare_baseline_params(w1, b1, w2, b2):
    """One-time packing (PyTorch layout in) of all parameters into a single
    (8,128)-aligned f32 buffer: cols [0:I] = w1, [I] = b1, [I+1:I+1+O] = w2^T,
    [I+1+O] = b2 (rows 0:O). <1 KiB of real data -> one resident DMA per call."""
    n_hidden, n_input = w1.shape
    n_output = w2.shape[0]
    assert n_input + n_output + 2 <= _PARAM_LANES, "packed layout needs <= 128 columns"
    rows = _round_up(max(n_hidden, n_output), 8)
    packed = jnp.zeros((rows, _PARAM_LANES), jnp.float32)
    packed = packed.at[:n_hidden, 0:n_input].set(w1.astype(jnp.float32))
    packed = packed.at[:n_hidden, n_input].set(b1.astype(jnp.float32))
    packed = packed.at[:n_hidden, n_input + 1:n_input + 1 + n_output].set(
        jnp.transpose(w2).astype(jnp.float32))
    packed = packed.at[:n_output, n_input + 1 + n_output].set(b2.astype(jnp.float32))
    return packed


def make_baseline_forward(n_input, n_hidden, n_output, max_tile=_MAX_LANE_TILE):
    """Returns (forward, forward_lane_major):
         forward(x: (B, n_input), packed) -> (B, n_output)        PyTorch-layout wrapper
         forward_lane_major(x_t: (n_input, B), packed) -> (n_output, B)   lane-dense hot path
    """
    kernel = _make_kernel(n_input, n_hidden, n_output)

    def _run(x_t, packed):
        batch = x_t.shape[1]
        tile_b = _choose_tile(batch, max_tile)
        grid = (pl.cdiv(batch, tile_b),)
        rows = packed.shape[0]
        return pl.pallas_call(
            kernel,
            out_shape=jax.ShapeDtypeStruct((n_output, batch), x_t.dtype),
            grid=grid,
            in_specs=[
                pl.BlockSpec((n_input, tile_b), lambda i: (0, i)),      # x: lane-streamed
                pl.BlockSpec((rows, _PARAM_LANES), lambda i: (0, 0)),   # params VMEM-resident
            ],
            out_specs=pl.BlockSpec((n_output, tile_b), lambda i: (0, i)),
            compiler_params=pltpu.CompilerParams(
                dimension_semantics=("parallel",),   # batch axis: split across v7x's 2 TCs
            ),
        )(x_t, packed)

    forward_lane_major = jax.jit(_run)

    @jax.jit
    def forward(x, packed):
        # Thin convenience wrapper keeping the PyTorch (B, n_input) -> (B, n_output)
        # signature. The transpose is a few-KiB glue op; callers that keep rollout
        # buffers batch-on-lanes should use forward_lane_major directly.
        out = _run(jnp.transpose(x), packed)                 # (n_output, B)
        if n_output == 1:
            return out.reshape(x.shape[0], 1)                # contiguous -> free reshape
        return jnp.transpose(out)

    return forward, forward_lane_major


def init_baseline_params(key, n_input, n_hidden, n_output):
    """Deterministic init mimicking nn.Linear default U(-1/sqrt(fan_in), 1/sqrt(fan_in))."""
    k1, k2, k3, k4 = jax.random.split(key, 4)
    bound1 = 1.0 / jnp.sqrt(jnp.float32(n_input))
    bound2 = 1.0 / jnp.sqrt(jnp.float32(n_hidden))
    w1 = jax.random.uniform(k1, (n_hidden, n_input), jnp.float32, -bound1, bound1)
    b1 = jax.random.uniform(k2, (n_hidden,), jnp.float32, -bound1, bound1)
    w2 = jax.random.uniform(k3, (n_output, n_hidden), jnp.float32, -bound2, bound2)
    b2 = jax.random.uniform(k4, (n_output,), jnp.float32, -bound2, bound2)
    return w1, b1, w2, b2


if __name__ == "__main__":
    # CartPole-ish sizes: 4-d observation, 32 hidden units, scalar value output.
    n_input, n_hidden, n_output = 4, 32, 1

    key = jax.random.PRNGKey(0)
    k_x, k_p, k_x2 = jax.random.split(key, 3)
    w1, b1, w2, b2 = init_baseline_params(k_p, n_input, n_hidden, n_output)
    packed = prepare_baseline_params(w1, b1, w2, b2)          # layout prep done ONCE
    forward, forward_lane_major = make_baseline_forward(n_input, n_hidden, n_output)

    def reference(x):
        h = jnp.maximum(x @ w1.T + b1, 0.0)
        return h @ w2.T + b2

    # 1) Small per-step batch (single exact block, no pad/slice glue).
    x_small = jax.random.normal(k_x, (8, n_input), dtype=jnp.float32)
    y_small = jax.block_until_ready(forward(x_small, packed))
    assert y_small.shape == (8, n_output)
    assert jnp.allclose(y_small, reference(x_small), atol=1e-4, rtol=1e-4)

    # 2) Lane-major hot path (caller keeps batch on lanes): same numbers, no glue at all.
    y_lane = jax.block_until_ready(forward_lane_major(x_small.T, packed))
    assert y_lane.shape == (n_output, 8)
    assert jnp.allclose(y_lane.T, y_small, atol=1e-5, rtol=1e-5)

    # 3) Batched rollout with a ragged (non-multiple-of-128) batch: exercises the
    #    masked last block -- no jnp.pad / output slice in the hot path.
    x_big = jax.random.normal(k_x2, (1027, n_input), dtype=jnp.float32)
    y_big = jax.block_until_ready(forward(x_big, packed))
    assert y_big.shape == (1027, n_output)
    assert jnp.allclose(y_big, reference(x_big), atol=1e-4, rtol=1e-4)

    print("KERNEL_OK")
</pallas_src>

<mosaic_0001>
module attributes {stable_mosaic.version = 11 : i64} {
  func.func @kernel(%arg0: i32, %arg1: memref<4x8xf32, #tpu.memory_space<vmem>>, %arg2: memref<32x128xf32, #tpu.memory_space<vmem>>, %arg3: memref<1x8xf32, #tpu.memory_space<vmem>>) attributes {dimension_semantics = [#tpu.dimension_semantics<parallel>], iteration_bounds = array<i64: 1>, scalar_prefetch = 0 : i64, scratch_operands = 0 : i64, tpu.core_type = #tpu.core_type<tc>, window_params = [{transform_indices = @transform_0, window_bounds = array<i64: 4, 8>}, {pipeline_mode = #tpu.pipeline_mode<synchronous>, transform_indices = @transform_1, window_bounds = array<i64: 32, 128>}, {transform_indices = @transform_2, window_bounds = array<i64: 1, 8>}]} {
    %c0 = arith.constant 0 : index
    %c0_0 = arith.constant 0 : index
    %0 = vector.load %arg1[%c0, %c0_0] : memref<4x8xf32, #tpu.memory_space<vmem>>, vector<4x8xf32>
    %c0_1 = arith.constant 0 : index
    %c0_2 = arith.constant 0 : index
    %1 = vector.load %arg2[%c0_1, %c0_2] : memref<32x128xf32, #tpu.memory_space<vmem>>, vector<32x128xf32>
    %2 = vector.extract_strided_slice %1 {offsets = [0, 4], sizes = [32, 1], strides = [1, 1]} : vector<32x128xf32> to vector<32x1xf32>
    %3 = vector.extract_strided_slice %1 {offsets = [0, 0], sizes = [32, 1], strides = [1, 1]} : vector<32x128xf32> to vector<32x1xf32>
    %4 = vector.extract_strided_slice %0 {offsets = [0, 0], sizes = [1, 8], strides = [1, 1]} : vector<4x8xf32> to vector<1x8xf32>
    %5 = vector.broadcast %3 : vector<32x1xf32> to vector<32x8xf32>
    %6 = vector.broadcast %4 : vector<1x8xf32> to vector<32x8xf32>
    %7 = arith.mulf %5, %6 : vector<32x8xf32>
    %8 = vector.broadcast %2 : vector<32x1xf32> to vector<32x8xf32>
    %9 = arith.addf %8, %7 : vector<32x8xf32>
    %10 = vector.extract_strided_slice %1 {offsets = [0, 1], sizes = [32, 1], strides = [1, 1]} : vector<32x128xf32> to vector<32x1xf32>
    %11 = vector.extract_strided_slice %0 {offsets = [1, 0], sizes = [1, 8], strides = [1, 1]} : vector<4x8xf32> to vector<1x8xf32>
    %12 = vector.broadcast %10 : vector<32x1xf32> to vector<32x8xf32>
    %13 = vector.broadcast %11 : vector<1x8xf32> to vector<32x8xf32>
    %14 = arith.mulf %12, %13 : vector<32x8xf32>
    %15 = arith.addf %9, %14 : vector<32x8xf32>
    %16 = vector.extract_strided_slice %1 {offsets = [0, 2], sizes = [32, 1], strides = [1, 1]} : vector<32x128xf32> to vector<32x1xf32>
    %17 = vector.extract_strided_slice %0 {offsets = [2, 0], sizes = [1, 8], strides = [1, 1]} : vector<4x8xf32> to vector<1x8xf32>
    %18 = vector.broadcast %16 : vector<32x1xf32> to vector<32x8xf32>
    %19 = vector.broadcast %17 : vector<1x8xf32> to vector<32x8xf32>
    %20 = arith.mulf %18, %19 : vector<32x8xf32>
    %21 = arith.addf %15, %20 : vector<32x8xf32>
    %22 = vector.extract_strided_slice %1 {offsets = [0, 3], sizes = [32, 1], strides = [1, 1]} : vector<32x128xf32> to vector<32x1xf32>
    %23 = vector.extract_strided_slice %0 {offsets = [3, 0], sizes = [1, 8], strides = [1, 1]} : vector<4x8xf32> to vector<1x8xf32>
    %24 = vector.broadcast %22 : vector<32x1xf32> to vector<32x8xf32>
    %25 = vector.broadcast %23 : vector<1x8xf32> to vector<32x8xf32>
    %26 = arith.mulf %24, %25 : vector<32x8xf32>
    %27 = arith.addf %21, %26 : vector<32x8xf32>
    %cst = arith.constant 0.000000e+00 : f32
    %28 = vector.broadcast %cst : f32 to vector<32x8xf32>
    %29 = arith.maximumf %27, %28 : vector<32x8xf32>
    %30 = vector.extract_strided_slice %1 {offsets = [0, 5], sizes = [32, 1], strides = [1, 1]} : vector<32x128xf32> to vector<32x1xf32>
    %31 = vector.extract_strided_slice %1 {offsets = [0, 6], sizes = [1, 1], strides = [1, 1]} : vector<32x128xf32> to vector<1x1xf32>
    %32 = vector.broadcast %30 : vector<32x1xf32> to vector<32x8xf32>
    %33 = arith.mulf %29, %32 : vector<32x8xf32>
    %cst_3 = arith.constant dense<0.000000e+00> : vector<8xf32>
    %34 = vector.multi_reduction <add>, %33, %cst_3 [0] : vector<32x8xf32> to vector<8xf32>
    %35 = vector.shape_cast %34 : vector<8xf32> to vector<1x8xf32>
    %36 = vector.broadcast %31 : vector<1x1xf32> to vector<1x8xf32>
    %37 = arith.addf %35, %36 : vector<1x8xf32>
    %c0_4 = arith.constant 0 : index
    %c0_5 = arith.constant 0 : index
    %38 = vector.load %arg3[%c0_4, %c0_5] : memref<1x8xf32, #tpu.memory_space<vmem>>, vector<1x8xf32>
    tpu.vector_store %arg3[%c0_4, %c0_5], %37 {strides = array<i32>} : memref<1x8xf32, #tpu.memory_space<vmem>>, vector<1x8xf32>,
    return
  }
  func.func @transform_0(%arg0: i32) -> (i32, i32) {
    %c0_i32 = arith.constant 0 : i32
    %c0_i32_0 = arith.constant 0 : i32
    return %c0_i32, %arg0 : i32, i32
  }
  func.func @transform_1(%arg0: i32) -> (i32, i32) {
    %c0_i32 = arith.constant 0 : i32
    %c0_i32_0 = arith.constant 0 : i32
    %c0_i32_1 = arith.constant 0 : i32
    return %c0_i32, %c0_i32_0 : i32, i32
  }
  func.func @transform_2(%arg0: i32) -> (i32, i32) {
    %c0_i32 = arith.constant 0 : i32
    %c0_i32_0 = arith.constant 0 : i32
    return %c0_i32, %arg0 : i32, i32
  }
}

</mosaic_0001>

<bundles_post_ra>
// kernel: forward.1
= control target key start
LH: loop header
LB: loop body
LE: loop exit
PB: predicated region body
PF: predicated region fallthrough
CT: control target
= control target key end

     0   :  { %7 = vsyncpa [#allocation3], 0  ;;  %s410_s0 = inlined_call_operand.hbm [shape: f32[4,8], index: 0, kind: input, shape index: {}]   ;;  %s411_s1 = inlined_call_operand.hbm [shape: f32[32,128], index: 1, kind: input, shape index: {}]   ;;  %s412_s2 = inlined_call_operand.hbm [shape: f32[1,8], index: 2, kind: output, shape index: {}]  }
   0x1   :  { %8 = vsyncpa [#allocation6], 0 }
   0x2   :  { %9 = vsyncpa [#allocation4], 0  ;;  %s340_s9 = smov [#allocation2]   ;;  %s341_s11 = smov [#allocation5]  }
   0x3   :  { %s16_s10 = sshll.u32 %s340_s9, 4  ;;  %s25_s12 = sshll.u32 %s341_s11, 4  ;;  %s17_s10 = int_to_ptr.vmem [resolvable:$true] %s16_s10  ;;  %s367_s12 = int_to_ptr.vmem [resolvable:$true] %s25_s12 }
   0x4   :  { %s268_s15 = scalar_lea.hbm %s410_s0, 64 }
   0x5   :  { %p269_p0 = scmp.ne.s32.totalorder %s410_s0, %s268_s15  ;;  %p272_p1 = scmp.lt.u32.totalorder %s268_s15, %s410_s0 }
   0x7   :  { %p274_p2 = pnand %p272_p1, %p269_p0 }
   0x9   :  { %277 = shalt.err (!%p274_p2)
}
   0xa   :  { %s278_s20 = scalar_lea.vmem %s17_s10, 64  ;;  %p283_p4 = scmp.lt.s32.totalorder %s17_s10, %s17_s10 }
   0xb   :  { %p279_p3 = scmp.ne.s32.totalorder %s17_s10, %s278_s20  ;;  %p284_p5 = scmp.lt.s32.totalorder %s278_s20, %s278_s20 }
   0xd   :  { %p285_p6 = por %p284_p5, %p283_p4 }
   0xf   :  { %p286_p7 = pnand %p285_p6, %p279_p3 }
  0x11   :  { %289 = shalt.err (!%p286_p7)
}
  0x12   :  { %19 = dma.hbm_to_vmem [thread:$0]  %s410_s0, 64, %s17_s10, [#allocation3]  }
  0x13   :  { %s290_s25 = scalar_lea.hbm %s411_s1, 512 }
  0x14   :  { %p291_p8 = scmp.ne.s32.totalorder %s411_s1, %s290_s25  ;;  %p294_p9 = scmp.lt.u32.totalorder %s290_s25, %s411_s1 }
  0x16   :  { %p296_p10 = pnand %p294_p9, %p291_p8 }
  0x18   :  { %299 = shalt.err (!%p296_p10)
}
  0x19   :  { %s300_s30 = scalar_lea.vmem %s367_s12, 512  ;;  %p305_p12 = scmp.lt.s32.totalorder %s367_s12, %s367_s12 }
  0x1a   :  { %p301_p11 = scmp.ne.s32.totalorder %s367_s12, %s300_s30  ;;  %p306_p13 = scmp.lt.s32.totalorder %s300_s30, %s300_s30 }
  0x1c   :  { %p307_p0 = por %p306_p13, %p305_p12 }
  0x1e   :  { %p308_p1 = pnand %p307_p0, %p301_p11 }
  0x20   :  { %311 = shalt.err (!%p308_p1)
}
  0x21   :  { %s342_s0 = smov 128   ;;  %s343_s3 = smov 8  }
  0x22   :  { %31 = dma.hbm_to_vmem [thread:$0]  %s411_s1, 512, %s367_s12, [#allocation6], %s342_s0, %s342_s0, %s343_s3  }
  0x23   :  { %334 = dma.done.wait [#allocation3], 64  }
  0x24   :  { %335 = vsyncadd [#allocation3], 4294967232 }
  0x25   :  { %336 = dma.done.wait [#allocation6], 512  }
  0x26   :  { %337 = vsyncadd [#allocation6], 4294966784  ;;  %v344_v0 = vmov 0   ;;  %v41_v1 = vld [vmem:[#allocation5 + $0x10] sm:$0xff]  ;;  %v39_v2 = vld [vmem:[#allocation5] sm:$0xff]  ;;  %v345_v4 = vmov 4   ;;  %v63_v20 = vlaneseq }
  0x27   :  { %249 = vset.pattern.permute.xlu1 %v344_v0  ;;  %248 = vset.pattern.permute.xlu0 %v344_v0  ;;  %v40_v3 = vld [vmem:[#allocation5 + $0x8] sm:$0xff]  ;;  %v346_v5 = vmov 1   ;;  %v42_v6 = vld [vmem:[#allocation5 + $0x18] sm:$0xff]  ;;  %v347_v7 = vmov 2   ;;  %v348_v8 = vmov 3   ;;  %v349_v9 = vmov 5  }
  0x28   :  { %55 = vperm.xlu1 %249, %v41_v1   ;;  %45 = vperm.xlu0 %248, %v39_v2   ;;  %v350_v10 = vmov 6   ;;  %v64_v22 = vshrl.u32 %v63_v20, 7  ;;  %v38_v26 = vld [vmem:[#allocation2] sm:$0xf]  ;;  %vm199_vm0 = vcmask 64512   ;;  %s351_s1 = smov [#allocation7]  }
  0x29   :  { %s226_s6 = sshll.u32 %s351_s1, 4  ;;  %vm218_vm1 = vcmask 57344   ;;  %s227_s6 = int_to_ptr.vmem [resolvable:$true] %s226_s6 }
  0x2a   :  { %v65_v24 = vsub.s32 0, %v64_v22  ;;  %v109_v27 = vsub.s32 1, %v64_v22  ;;  %v137_v32 = vsub.s32 2, %v64_v22  ;;  %v165_v35 = vsub.s32 3, %v64_v22  ;;  %s312_s7 = scalar_lea.vmem %s227_s6, 16  ;;  %s316_s8 = scalar_lea.vmem %s227_s6, 32 }
  0x2b   :  { %p313_p2 = scmp.ne.s32.totalorder %s227_s6, %s312_s7  ;;  %p317_p3 = scmp.lt.s32.totalorder %s227_s6, %s227_s6 }
  0x2c   :  { %250 = vset.pattern.permute.xlu1 %v345_v4  ;;  %251 = vset.pattern.permute.xlu0 %v345_v4  ;;  %v66_v29 = vrot.slane %v38_v26, %v65_v24  ;;  %v110_v33 = vrot.slane %v38_v26, %v109_v27  ;;  %v138_v39 = vrot.slane %v38_v26, %v137_v32  ;;  %p318_p4 = scmp.lt.s32.totalorder %s316_s8, %s312_s7 }
  0x2d   :  { %72 = vperm.xlu1 %250, %v39_v2   ;;  %76 = vperm.xlu0 %251, %v40_v3   ;;  %v166_v43 = vrot.slane %v38_v26, %v165_v35 }
  0x2e   :  { %p319_p5 = por %p318_p4, %p317_p3 }
  0x30   :  { %p320_p6 = pnand %p319_p5, %p313_p2 }
  0x31   :  { %253 = vset.pattern.permute.xlu1 %v346_v5  ;;  %252 = vset.pattern.permute.xlu0 %v344_v0 }
  0x32   :  { %92 = vperm.xlu1 %253, %v39_v2   ;;  %50 = vperm.xlu0 %252, %v40_v3  }
  0x36   :  { %96 = vperm.xlu1 %253, %v40_v3   ;;  %60 = vperm.xlu0 %252, %v42_v6  }
  0x3a   :  { %254 = vset.pattern.permute.xlu1 %v345_v4  ;;  %256 = vset.pattern.permute.xlu0 %v347_v7 }
  0x3b   :  { %80 = vperm.xlu1 %254, %v41_v1   ;;  %120 = vperm.xlu0 %256, %v39_v2  }
  0x3f   :  { %255 = vset.pattern.permute.xlu1 %v346_v5  ;;  %259 = vset.pattern.permute.xlu0 %v346_v5 }
  0x40   :  { %100 = vperm.xlu1 %255, %v41_v1   ;;  %104 = vperm.xlu0 %259, %v42_v6  }
  0x44   :  { %257 = vset.pattern.permute.xlu1 %v347_v7  ;;  %262 = vset.pattern.permute.xlu0 %v348_v8 }
  0x45   :  { %124 = vperm.xlu1 %257, %v40_v3   ;;  %152 = vperm.xlu0 %262, %v40_v3  }
  0x49   :  { %258 = vset.pattern.permute.xlu1 %v345_v4  ;;  %160 = vperm.xlu0 %262, %v42_v6  }
  0x4a   :  { %84 = vperm.xlu1 %258, %v42_v6  }
  0x4d   :  { %266 = vset.pattern.permute.xlu0 %v349_v9 }
  0x4e   :  { %260 = vset.pattern.permute.xlu1 %v347_v7  ;;  %184 = vperm.xlu0 %266, %v40_v3  }
  0x4f   :  { %128 = vperm.xlu1 %260, %v41_v1  }
  0x52   :  { %267 = vset.pattern.permute.xlu0 %v350_v10 }
  0x53   :  { %261 = vset.pattern.permute.xlu1 %v348_v8  ;;  %214 = vperm.xlu0 %267, %v39_v2  }
  0x54   :  { %148 = vperm.xlu1 %261, %v39_v2  }
  0x58   :  { %263 = vset.pattern.permute.xlu1 %v347_v7 }
  0x59   :  { %132 = vperm.xlu1 %263, %v42_v6  }
  0x5d   :  { %264 = vset.pattern.permute.xlu1 %v348_v8 }
  0x5e   :  { %156 = vperm.xlu1 %264, %v41_v1  }
  0x62   :  { %265 = vset.pattern.permute.xlu1 %v349_v9 }
  0x63   :  { %180 = vperm.xlu1 %265, %v39_v2  }
  0x67   :  { %188 = vperm.xlu1 %265, %v41_v1  }
  0x6b   :  { %192 = vperm.xlu1 %265, %v42_v6  }
  0xa7   :  { %v56_v11 = vpop.permute.xlu1 %55  ;;  %v46_v14 = vpop.permute.xlu0 %45 }
  0xa8   :  { %v67_v36 = vmul.f32 %v66_v29, %v46_v14  ;;  %v69_v49 = vmul.f32 %v66_v29, %v56_v11 }
  0xac   :  { %v73_v12 = vpop.permute.xlu1 %72  ;;  %v77_v16 = vpop.permute.xlu0 %76 }
  0xad   :  { %v87_v44 = vadd.f32 %v73_v12, %v67_v36 }
  0xb1   :  { %v93_v13 = vpop.permute.xlu1 %92  ;;  %v51_v19 = vpop.permute.xlu0 %50 }
  0xb2   :  { %v68_v31 = vmul.f32 %v66_v29, %v51_v19  ;;  %v111_v41 = vmul.f32 %v110_v33, %v93_v13 }
  0xb4   :  { %v88_v37 = vadd.f32 %v77_v16, %v68_v31  ;;  %v115_v50 = vadd.f32 %v111_v41, %v87_v44 }
  0xb5   :  { %v97_v15 = vpop.permute.xlu1 %96  ;;  %v61_v23 = vpop.permute.xlu0 %60 }
  0xb6   :  { %v112_v38 = vmul.f32 %v110_v33, %v97_v15  ;;  %v70_v47 = vmul.f32 %v66_v29, %v61_v23 }
  0xb8   :  { %v116_v46 = vadd.f32 %v112_v38, %v88_v37 }
  0xba   :  { %v81_v17 = vpop.permute.xlu1 %80  ;;  %v121_v28 = vpop.permute.xlu0 %120 }
  0xbb   :  { %v139_v48 = vmul.f32 %v138_v39, %v121_v28  ;;  %v89_v56 = vadd.f32 %v81_v17, %v69_v49 }
  0xbd   :  { %v143_v57 = vadd.f32 %v139_v48, %v115_v50 }
  0xbf   :  { %v101_v18 = vpop.permute.xlu1 %100  ;;  %v105_v34 = vpop.permute.xlu0 %104 }
  0xc0   :  { %v113_v52 = vmul.f32 %v110_v33, %v101_v18  ;;  %v114_v58 = vmul.f32 %v110_v33, %v105_v34 }
  0xc2   :  { %v117_v62 = vadd.f32 %v113_v52, %v89_v56 }
  0xc4   :  { %v125_v21 = vpop.permute.xlu1 %124  ;;  %v153_v45 = vpop.permute.xlu0 %152 }
  0xc5   :  { %v140_v42 = vmul.f32 %v138_v39, %v125_v21  ;;  %v168_v54 = vmul.f32 %v166_v43, %v153_v45 }
  0xc7   :  { %v144_v53 = vadd.f32 %v140_v42, %v116_v46 }
  0xc8   :  { %v161_v61 = vpop.permute.xlu0 %160 }
  0xc9   :  { %v85_v25 = vpop.permute.xlu1 %84  ;;  %v172_v63 = vadd.f32 %v168_v54, %v144_v53  ;;  %v170_v6 = vmul.f32 %v166_v43, %v161_v61 }
  0xca   :  { %v90_v59 = vadd.f32 %v85_v25, %v70_v47 }
  0xcb   :  { %v176_v7 = vmax.f32 %v172_v63, 0.0 }
  0xcc   :  { %v118_v4 = vadd.f32 %v114_v58, %v90_v59 }
  0xcd   :  { %v185_v11 = vpop.permute.xlu0 %184 }
  0xce   :  { %v129_v30 = vpop.permute.xlu1 %128  ;;  %v196_v14 = vmul.f32 %v185_v11, %v176_v7 }
  0xcf   :  { %v141_v60 = vmul.f32 %v138_v39, %v129_v30 }
  0xd0   :  { %v201_v20 = vsel %vm199_vm0, %v196_v14, 0.0 }
  0xd1   :  { %v145_v5 = vadd.f32 %v141_v60, %v117_v62 }
  0xd2   :  { %v215_v34 = vpop.permute.xlu0 %214 }
  0xd3   :  { %v149_v40 = vpop.permute.xlu1 %148 }
  0xd4   :  { %v167_v55 = vmul.f32 %v166_v43, %v149_v40 }
  0xd6   :  { %v171_v0 = vadd.f32 %v167_v55, %v143_v57 }
  0xd8   :  { %v133_v51 = vpop.permute.xlu1 %132  ;;  %v175_v10 = vmax.f32 %v171_v0, 0.0 }
  0xd9   :  { %v142_v1 = vmul.f32 %v138_v39, %v133_v51 }
  0xdb   :  { %v146_v8 = vadd.f32 %v142_v1, %v118_v4 }
  0xdd   :  { %v157_v2 = vpop.permute.xlu1 %156  ;;  %v174_v16 = vadd.f32 %v170_v6, %v146_v8 }
  0xde   :  { %v169_v3 = vmul.f32 %v166_v43, %v157_v2 }
  0xdf   :  { %v178_v22 = vmax.f32 %v174_v16, 0.0 }
  0xe0   :  { %v173_v9 = vadd.f32 %v169_v3, %v145_v5 }
  0xe2   :  { %v181_v12 = vpop.permute.xlu1 %180  ;;  %v177_v15 = vmax.f32 %v173_v9, 0.0 }
  0xe3   :  { %v195_v13 = vmul.f32 %v181_v12, %v175_v10 }
  0xe5   :  { %v200_v18 = vsel %vm199_vm0, %v195_v13, 0.0 }
  0xe6   :  { %v189_v17 = vpop.permute.xlu1 %188  ;;  %v202_v23 = vadd.f32 %v201_v20, %v200_v18 }
  0xe7   :  { %v197_v19 = vmul.f32 %v189_v17, %v177_v15 }
  0xe9   :  { %v203_v21 = vsel %vm199_vm0, %v197_v19, 0.0 }
  0xea   :  { %v193_v24 = vpop.permute.xlu1 %192  ;;  %v204_v26 = vadd.f32 %v203_v21, %v202_v23 }
  0xeb   :  { %v198_v25 = vmul.f32 %v193_v24, %v178_v22 }
  0xed   :  { %v205_v27 = vsel %vm199_vm0, %v198_v25, 0.0 }
  0xee   :  { %v206_v28 = vadd.f32 %v205_v27, %v204_v26 }
  0xf0   :  { %v207_v29 = vrot.slane %v206_v28, 4 }
  0xf2   :  { %v208_v30 = vadd.f32 %v207_v29, %v206_v28 }
  0xf4   :  { %v209_v31 = vrot.slane %v208_v30, 2 }
  0xf6   :  { %v210_v32 = vadd.f32 %v209_v31, %v208_v30 }
  0xf8   :  { %v211_v33 = vrot.slane %v210_v32, 1 }
  0xfa   :  { %v212_v35 = vadd.f32 %v211_v33, %v210_v32 }
  0xfc   :  { %v217_v36 = vadd.f32 %v215_v34, %v212_v35 }
  0xfe   :  { %219 = vst.msk [vmem:[#allocation7] sm:$0x1] %vm218_vm1, %v217_v36 }
  0xff   :  { %323 = shalt.err (!%p320_p6)
}
 0x100   :  { %s324_s11 = scalar_lea.hbm %s412_s2, 16 }
 0x101   :  { %p325_p7 = scmp.ne.s32.totalorder %s412_s2, %s324_s11  ;;  %p328_p8 = scmp.lt.u32.totalorder %s324_s11, %s412_s2 }
 0x103   :  { %p330_p9 = pnand %p328_p8, %p325_p7 }
 0x105   :  { %333 = shalt.err (!%p330_p9)
}
 0x106   :  { %229 = dma.vmem_to_hbm [thread:$0]  %s227_s6, 16, %s412_s2, [#allocation4]  }
 0x107   :  { %338 = dma.done.wait [#allocation4], 16  }
 0x108   :  { %339 = vsyncadd [#allocation4], 4294967280 }
 0x109   :  { %233 = vsyncpa [#allocation3], 1 }
 0x10a   :  { %234 = vsyncpa [#allocation6], 1 }
 0x10b   :  { %235 = vsyncpa [#allocation4], 1 }

</bundles_post_ra>
